<compile_context>
chip_gen: v5e
topology: v5e:2x2
jax: 0.10.0
libtpu: 0.0.40
codegen_flags: <defaults>
</compile_context>

<pallas_src>
import functools

import jax
import jax.numpy as jnp
from jax.experimental import pallas as pl
from jax.experimental.pallas import tpu as pltpu

# ----------------------------- model config ---------------------------------
INPUT_DIM = 40
HIDDEN_DIM = 32
FF_DIM = HIDDEN_DIM * 4          # 128 == LANE, so FFN fills the lanes exactly
N_LAYERS = 2
N_HEADS = 4                      # no-op with seq_len == 1
N_CLASSES = 7
BATCH = 2
LN_EPS = 1e-5

LANE = 128                       # vreg lane width / slab minor dim
SUBLANE = 8                      # vreg sublane count (batch padding unit)
BATCH_BLOCK = 256                # batch tile for the gridded (serving) path

# slab layout ---------------------------------------------------------------
# weights: 0 = input_proj, then per layer [attn, ffn1, ffn2], last = fc head
N_W = 2 + 3 * N_LAYERS
W_IN, W_FC = 0, 1 + 3 * N_LAYERS
# biases/scales: 0 = input_proj bias, per layer 7 rows
# [b_attn, b_ff1, b_ff2, ln1_g, ln1_b, ln2_g, ln2_b], last = fc bias
# (last layer's ln2_g / ln2_b rows are unused: folded into the fc head)
N_B = 2 + 7 * N_LAYERS
B_IN, B_FC = 0, 1 + 7 * N_LAYERS

assert FF_DIM <= LANE, "packing assumes dim_feedforward fits in one lane tile"


def _round_up(n, m):
    return ((n + m - 1) // m) * m


# ------------------------------- kernel -------------------------------------
def emotion_transformer_kernel(x_ref, w_ref, b_ref, out_ref):
    """x_ref: (bm, 128) zero-padded input; w_ref: (N_W,128,128); b_ref: (N_B,1,128)."""
    f32 = jnp.float32
    inv_h = 1.0 / HIDDEN_DIM

    def ln_norm(x):
        # x is (bm, 128) with real data in lanes [:HIDDEN_DIM], zeros elsewhere.
        # sum/H and E[x^2]-mean^2 keep the padded (zero) lanes out of the
        # statistics without any masking.
        mean = jnp.sum(x, axis=-1, keepdims=True) * inv_h
        ex2 = jnp.sum(x * x, axis=-1, keepdims=True) * inv_h
        var = ex2 - mean * mean
        return (x - mean) * jax.lax.rsqrt(var + LN_EPS)

    # input_proj (weights already transposed & zero-padded to 128x128)
    h = jnp.dot(x_ref[...], w_ref[W_IN], preferred_element_type=f32) + b_ref[B_IN]

    for l in range(N_LAYERS):
        wb = 1 + 3 * l          # weight base for this layer
        bb = 1 + 7 * l          # bias base for this layer

        # ---- self attention (seq_len == 1, folded: out_proj o v_proj) -------
        attn = jnp.dot(h, w_ref[wb + 0], preferred_element_type=f32) + b_ref[bb + 0]
        # padded lanes of gamma/beta are zero -> h stays zero-padded
        h = ln_norm(h + attn) * b_ref[bb + 3] + b_ref[bb + 4]

        # ---- feed-forward: linear2(relu(linear1(h))) -------------------------
        ff = jnp.dot(h, w_ref[wb + 1], preferred_element_type=f32) + b_ref[bb + 1]
        ff = jnp.maximum(ff, 0.0)
        ff = jnp.dot(ff, w_ref[wb + 2], preferred_element_type=f32) + b_ref[bb + 2]
        z = h + ff
        if l == N_LAYERS - 1:
            # final LN: gamma/beta are folded into the fc weights/bias; the
            # (nonzero) padded lanes of the bare normalization hit zero rows
            # of the fc weight, so they never reach the logits.
            h = ln_norm(z)
        else:
            h = ln_norm(z) * b_ref[bb + 5] + b_ref[bb + 6]

    # fc head (dropout == identity at inference); lane-dense (bm, 128) store.
    logits = jnp.dot(h, w_ref[W_FC], preferred_element_type=f32) + b_ref[B_FC]
    out_ref[...] = logits.astype(out_ref.dtype)


# --------------------------- parameter handling ------------------------------
def init_params(key):
    """Synthetic parameters with the PyTorch module's shapes/layout.

    q/k projections are omitted: with seq_len == 1 they cannot affect the
    output (softmax over one key is exactly 1).  LayerNorm gamma/beta carry
    noise so the packing/folding path is fully exercised by the test."""
    H, L, F = HIDDEN_DIM, N_LAYERS, FF_DIM
    ks = jax.random.split(key, 16)
    n = lambda k, shape, s=0.02: jax.random.normal(k, shape, jnp.float32) * s
    return dict(
        wp=n(ks[0], (H, INPUT_DIM)),           bp=n(ks[1], (1, H)),
        wv=n(ks[2], (L, H, H)),                bv=n(ks[3], (L, 1, H)),
        wo=n(ks[4], (L, H, H)),                bo=n(ks[5], (L, 1, H)),
        ln1g=1.0 + n(ks[6], (L, 1, H), 0.1),   ln1b=n(ks[7], (L, 1, H), 0.1),
        ln2g=1.0 + n(ks[8], (L, 1, H), 0.1),   ln2b=n(ks[9], (L, 1, H), 0.1),
        w1=n(ks[10], (L, F, H)),               b1=n(ks[11], (L, 1, F)),
        w2=n(ks[12], (L, H, F)),               b2=n(ks[13], (L, 1, H)),
        wfc=n(ks[14], (N_CLASSES, H)),         bfc=n(ks[15], (1, N_CLASSES)),
    )


def pack_params(p):
    """One-time host-side layout plumbing: transpose, fold attention, fold the
    final LayerNorm into the fc head, and pack everything into two lane-dense
    slabs (all padding lanes are zero)."""
    H, F, L, C = HIDDEN_DIM, FF_DIM, N_LAYERS, N_CLASSES

    wslab = jnp.zeros((N_W, LANE, LANE), jnp.float32)
    wslab = wslab.at[W_IN, :INPUT_DIM, :H].set(p["wp"].T)
    bslab = jnp.zeros((N_B, 1, LANE), jnp.float32)
    bslab = bslab.at[B_IN, :, :H].set(p["bp"])

    for l in range(L):
        wb, bb = 1 + 3 * l, 1 + 7 * l
        w_attn_t = (p["wo"][l] @ p["wv"][l]).T                 # == wv.T @ wo.T
        b_attn = p["bv"][l] @ p["wo"][l].T + p["bo"][l]
        wslab = wslab.at[wb + 0, :H, :H].set(w_attn_t)
        wslab = wslab.at[wb + 1, :H, :F].set(p["w1"][l].T)
        wslab = wslab.at[wb + 2, :F, :H].set(p["w2"][l].T)
        bslab = bslab.at[bb + 0, :, :H].set(b_attn)
        bslab = bslab.at[bb + 1, :, :F].set(p["b1"][l])
        bslab = bslab.at[bb + 2, :, :H].set(p["b2"][l])
        bslab = bslab.at[bb + 3, :, :H].set(p["ln1g"][l])
        bslab = bslab.at[bb + 4, :, :H].set(p["ln1b"][l])
        if l < L - 1:
            bslab = bslab.at[bb + 5, :, :H].set(p["ln2g"][l])
            bslab = bslab.at[bb + 6, :, :H].set(p["ln2b"][l])
        # last layer's ln2 gamma/beta are folded into the fc head below.

    g_last = p["ln2g"][L - 1][0]                               # (H,)
    b_last = p["ln2b"][L - 1][0]                               # (H,)
    wfc_fold = p["wfc"].T * g_last[:, None]                    # (H, C)
    bfc_fold = p["bfc"] + b_last[None, :] @ p["wfc"].T         # (1, C)
    wslab = wslab.at[W_FC, :H, :C].set(wfc_fold)
    bslab = bslab.at[B_FC, :, :C].set(bfc_fold)
    return wslab, bslab


# ------------------------------- wrapper -------------------------------------
@jax.jit
def emotion_transformer(x, wslab, bslab):
    B = x.shape[0]
    use_grid = B >= BATCH_BLOCK
    Bp = _round_up(B, BATCH_BLOCK if use_grid else SUBLANE)

    # zero-pad batch (sublane-aligned) and features (lane-dense) in one shot
    xp = jnp.zeros((Bp, LANE), jnp.float32).at[:B, :INPUT_DIM].set(
        x.astype(jnp.float32))

    flops_per_row = (2 * INPUT_DIM * HIDDEN_DIM
                     + N_LAYERS * (2 * HIDDEN_DIM * HIDDEN_DIM + 4 * HIDDEN_DIM * FF_DIM)
                     + 2 * HIDDEN_DIM * N_CLASSES)
    cost = pl.CostEstimate(
        flops=Bp * flops_per_row,
        transcendentals=Bp * 2 * N_LAYERS,
        bytes_accessed=4 * (xp.size + wslab.size + bslab.size + Bp * LANE),
    )
    out_shape = jax.ShapeDtypeStruct((Bp, LANE), jnp.float32)

    if use_grid:
        # Serving path: tile the batch, weight slabs stay resident (constant
        # index_map -> no re-DMA), batch axis parallel so a multi-core chip
        # (v7x megacore) splits the rows.
        out = pl.pallas_call(
            emotion_transformer_kernel,
            out_shape=out_shape,
            grid=(Bp // BATCH_BLOCK,),
            in_specs=[
                pl.BlockSpec((BATCH_BLOCK, LANE), lambda i: (i, 0)),
                pl.BlockSpec((N_W, LANE, LANE), lambda i: (0, 0, 0)),
                pl.BlockSpec((N_B, 1, LANE), lambda i: (0, 0, 0)),
            ],
            out_specs=pl.BlockSpec((BATCH_BLOCK, LANE), lambda i: (i, 0)),
            compiler_params=pltpu.CompilerParams(dimension_semantics=("parallel",)),
            cost_estimate=cost,
        )(xp, wslab, bslab)
    else:
        # Small-batch path: whole problem as one VMEM-resident block (3 DMAs in,
        # 1 lane-dense, sublane-aligned DMA out).
        vmem = pl.BlockSpec(memory_space=pltpu.MemorySpace.VMEM)
        out = pl.pallas_call(
            emotion_transformer_kernel,
            out_shape=out_shape,
            in_specs=[vmem, vmem, vmem],
            out_specs=vmem,
            cost_estimate=cost,
        )(xp, wslab, bslab)

    return out[:B, :N_CLASSES]


# ------------------------------ reference ------------------------------------
def _layernorm_ref(x, gamma, beta):
    mean = jnp.mean(x, axis=-1, keepdims=True)
    c = x - mean
    var = jnp.mean(c * c, axis=-1, keepdims=True)
    return c * jax.lax.rsqrt(var + LN_EPS) * gamma + beta


def reference_forward(x, p):
    """Pure-JAX reference mirroring the PyTorch forward (eval mode, unfolded attn/LN)."""
    h = x @ p["wp"].T + p["bp"]
    for l in range(N_LAYERS):
        v = h @ p["wv"][l].T + p["bv"][l]
        attn = v @ p["wo"][l].T + p["bo"][l]
        h = _layernorm_ref(h + attn, p["ln1g"][l], p["ln1b"][l])
        ff = jnp.maximum(h @ p["w1"][l].T + p["b1"][l], 0.0)
        ff = ff @ p["w2"][l].T + p["b2"][l]
        h = _layernorm_ref(h + ff, p["ln2g"][l], p["ln2b"][l])
    return h @ p["wfc"].T + p["bfc"]


if __name__ == "__main__":
    key = jax.random.PRNGKey(0)
    kx, kp = jax.random.split(key)
    x = jax.random.normal(kx, (BATCH, INPUT_DIM), jnp.float32)
    params = init_params(kp)
    wslab, bslab = pack_params(params)

    out = emotion_transformer(x, wslab, bslab)
    out = jax.block_until_ready(out)

    ref = reference_forward(x, params)
    assert out.shape == (BATCH, N_CLASSES), out.shape
    assert jnp.allclose(out, ref, atol=1e-4, rtol=1e-4), float(jnp.max(jnp.abs(out - ref)))
    print("KERNEL_OK")
</pallas_src>

<mosaic_0001>
module attributes {stable_mosaic.version = 11 : i64} {
  func.func @emotion_transformer_kernel(%arg0: memref<8x128xf32, #tpu.memory_space<vmem>>, %arg1: memref<8x128x128xf32, #tpu.memory_space<vmem>>, %arg2: memref<16x1x128xf32, #tpu.memory_space<vmem>>, %arg3: memref<8x128xf32, #tpu.memory_space<vmem>>) attributes {dimension_semantics = [], scalar_prefetch = 0 : i64, scratch_operands = 0 : i64, tpu.core_type = #tpu.core_type<tc>} {
    %c0 = arith.constant 0 : index
    %c0_0 = arith.constant 0 : index
    %0 = vector.load %arg0[%c0, %c0_0] : memref<8x128xf32, #tpu.memory_space<vmem>>, vector<8x128xf32>
    %c0_1 = arith.constant 0 : index
    %c0_2 = arith.constant 0 : index
    %c0_3 = arith.constant 0 : index
    %1 = vector.load %arg1[%c0_1, %c0_2, %c0_3] : memref<8x128x128xf32, #tpu.memory_space<vmem>>, vector<1x128x128xf32>
    %2 = vector.shape_cast %1 : vector<1x128x128xf32> to vector<128x128xf32>
    %cst = arith.constant dense<0.000000e+00> : vector<8x128xf32>
    %3 = tpu.matmul %0, %2, %cst {dimension_numbers = #tpu.dot_dimension_numbers<[1], [0], [0], [1], [0, 0, 1, 1], [], []>} : vector<8x128xf32>, vector<128x128xf32>, vector<8x128xf32> -> vector<8x128xf32>
    %c0_4 = arith.constant 0 : index
    %c0_5 = arith.constant 0 : index
    %c0_6 = arith.constant 0 : index
    %4 = vector.load %arg2[%c0_4, %c0_5, %c0_6] : memref<16x1x128xf32, #tpu.memory_space<vmem>>, vector<1x1x128xf32>
    %5 = vector.shape_cast %4 : vector<1x1x128xf32> to vector<1x128xf32>
    %6 = vector.broadcast %5 : vector<1x128xf32> to vector<8x128xf32>
    %7 = arith.addf %3, %6 : vector<8x128xf32>
    %c1 = arith.constant 1 : index
    %c0_7 = arith.constant 0 : index
    %c0_8 = arith.constant 0 : index
    %8 = vector.load %arg1[%c1, %c0_7, %c0_8] : memref<8x128x128xf32, #tpu.memory_space<vmem>>, vector<1x128x128xf32>
    %9 = vector.shape_cast %8 : vector<1x128x128xf32> to vector<128x128xf32>
    %cst_9 = arith.constant dense<0.000000e+00> : vector<8x128xf32>
    %10 = tpu.matmul %7, %9, %cst_9 {dimension_numbers = #tpu.dot_dimension_numbers<[1], [0], [0], [1], [0, 0, 1, 1], [], []>} : vector<8x128xf32>, vector<128x128xf32>, vector<8x128xf32> -> vector<8x128xf32>
    %c1_10 = arith.constant 1 : index
    %c0_11 = arith.constant 0 : index
    %c0_12 = arith.constant 0 : index
    %11 = vector.load %arg2[%c1_10, %c0_11, %c0_12] : memref<16x1x128xf32, #tpu.memory_space<vmem>>, vector<1x1x128xf32>
    %12 = vector.shape_cast %11 : vector<1x1x128xf32> to vector<1x128xf32>
    %13 = vector.broadcast %12 : vector<1x128xf32> to vector<8x128xf32>
    %14 = arith.addf %10, %13 : vector<8x128xf32>
    %15 = arith.addf %7, %14 : vector<8x128xf32>
    %cst_13 = arith.constant dense<0.000000e+00> : vector<8xf32>
    %16 = vector.multi_reduction <add>, %15, %cst_13 [1] : vector<8x128xf32> to vector<8xf32>
    %17 = vector.shape_cast %16 : vector<8xf32> to vector<8x1xf32>
    %cst_14 = arith.constant 3.125000e-02 : f32
    %18 = vector.broadcast %cst_14 : f32 to vector<8x1xf32>
    %19 = arith.mulf %17, %18 : vector<8x1xf32>
    %20 = arith.mulf %15, %15 : vector<8x128xf32>
    %cst_15 = arith.constant dense<0.000000e+00> : vector<8xf32>
    %21 = vector.multi_reduction <add>, %20, %cst_15 [1] : vector<8x128xf32> to vector<8xf32>
    %22 = vector.shape_cast %21 : vector<8xf32> to vector<8x1xf32>
    %cst_16 = arith.constant 3.125000e-02 : f32
    %23 = vector.broadcast %cst_16 : f32 to vector<8x1xf32>
    %24 = arith.mulf %22, %23 : vector<8x1xf32>
    %25 = arith.mulf %19, %19 : vector<8x1xf32>
    %26 = arith.subf %24, %25 : vector<8x1xf32>
    %27 = vector.broadcast %19 : vector<8x1xf32> to vector<8x128xf32>
    %28 = arith.subf %15, %27 : vector<8x128xf32>
    %cst_17 = arith.constant 9.99999974E-6 : f32
    %29 = vector.broadcast %cst_17 : f32 to vector<8x1xf32>
    %30 = arith.addf %26, %29 : vector<8x1xf32>
    %31 = math.rsqrt %30 : vector<8x1xf32>
    %32 = vector.broadcast %31 : vector<8x1xf32> to vector<8x128xf32>
    %33 = arith.mulf %28, %32 : vector<8x128xf32>
    %c4 = arith.constant 4 : index
    %c0_18 = arith.constant 0 : index
    %c0_19 = arith.constant 0 : index
    %34 = vector.load %arg2[%c4, %c0_18, %c0_19] : memref<16x1x128xf32, #tpu.memory_space<vmem>>, vector<1x1x128xf32>
    %35 = vector.shape_cast %34 : vector<1x1x128xf32> to vector<1x128xf32>
    %36 = vector.broadcast %35 : vector<1x128xf32> to vector<8x128xf32>
    %37 = arith.mulf %33, %36 : vector<8x128xf32>
    %c5 = arith.constant 5 : index
    %c0_20 = arith.constant 0 : index
    %c0_21 = arith.constant 0 : index
    %38 = vector.load %arg2[%c5, %c0_20, %c0_21] : memref<16x1x128xf32, #tpu.memory_space<vmem>>, vector<1x1x128xf32>
    %39 = vector.shape_cast %38 : vector<1x1x128xf32> to vector<1x128xf32>
    %40 = vector.broadcast %39 : vector<1x128xf32> to vector<8x128xf32>
    %41 = arith.addf %37, %40 : vector<8x128xf32>
    %c2 = arith.constant 2 : index
    %c0_22 = arith.constant 0 : index
    %c0_23 = arith.constant 0 : index
    %42 = vector.load %arg1[%c2, %c0_22, %c0_23] : memref<8x128x128xf32, #tpu.memory_space<vmem>>, vector<1x128x128xf32>
    %43 = vector.shape_cast %42 : vector<1x128x128xf32> to vector<128x128xf32>
    %cst_24 = arith.constant dense<0.000000e+00> : vector<8x128xf32>
    %44 = tpu.matmul %41, %43, %cst_24 {dimension_numbers = #tpu.dot_dimension_numbers<[1], [0], [0], [1], [0, 0, 1, 1], [], []>} : vector<8x128xf32>, vector<128x128xf32>, vector<8x128xf32> -> vector<8x128xf32>
    %c2_25 = arith.constant 2 : index
    %c0_26 = arith.constant 0 : index
    %c0_27 = arith.constant 0 : index
    %45 = vector.load %arg2[%c2_25, %c0_26, %c0_27] : memref<16x1x128xf32, #tpu.memory_space<vmem>>, vector<1x1x128xf32>
    %46 = vector.shape_cast %45 : vector<1x1x128xf32> to vector<1x128xf32>
    %47 = vector.broadcast %46 : vector<1x128xf32> to vector<8x128xf32>
    %48 = arith.addf %44, %47 : vector<8x128xf32>
    %cst_28 = arith.constant 0.000000e+00 : f32
    %49 = vector.broadcast %cst_28 : f32 to vector<8x128xf32>
    %50 = arith.maximumf %48, %49 : vector<8x128xf32>
    %c3 = arith.constant 3 : index
    %c0_29 = arith.constant 0 : index
    %c0_30 = arith.constant 0 : index
    %51 = vector.load %arg1[%c3, %c0_29, %c0_30] : memref<8x128x128xf32, #tpu.memory_space<vmem>>, vector<1x128x128xf32>
    %52 = vector.shape_cast %51 : vector<1x128x128xf32> to vector<128x128xf32>
    %cst_31 = arith.constant dense<0.000000e+00> : vector<8x128xf32>
    %53 = tpu.matmul %50, %52, %cst_31 {dimension_numbers = #tpu.dot_dimension_numbers<[1], [0], [0], [1], [0, 0, 1, 1], [], []>} : vector<8x128xf32>, vector<128x128xf32>, vector<8x128xf32> -> vector<8x128xf32>
    %c3_32 = arith.constant 3 : index
    %c0_33 = arith.constant 0 : index
    %c0_34 = arith.constant 0 : index
    %54 = vector.load %arg2[%c3_32, %c0_33, %c0_34] : memref<16x1x128xf32, #tpu.memory_space<vmem>>, vector<1x1x128xf32>
    %55 = vector.shape_cast %54 : vector<1x1x128xf32> to vector<1x128xf32>
    %56 = vector.broadcast %55 : vector<1x128xf32> to vector<8x128xf32>
    %57 = arith.addf %53, %56 : vector<8x128xf32>
    %58 = arith.addf %41, %57 : vector<8x128xf32>
    %cst_35 = arith.constant dense<0.000000e+00> : vector<8xf32>
    %59 = vector.multi_reduction <add>, %58, %cst_35 [1] : vector<8x128xf32> to vector<8xf32>
    %60 = vector.shape_cast %59 : vector<8xf32> to vector<8x1xf32>
    %cst_36 = arith.constant 3.125000e-02 : f32
    %61 = vector.broadcast %cst_36 : f32 to vector<8x1xf32>
    %62 = arith.mulf %60, %61 : vector<8x1xf32>
    %63 = arith.mulf %58, %58 : vector<8x128xf32>
    %cst_37 = arith.constant dense<0.000000e+00> : vector<8xf32>
    %64 = vector.multi_reduction <add>, %63, %cst_37 [1] : vector<8x128xf32> to vector<8xf32>
    %65 = vector.shape_cast %64 : vector<8xf32> to vector<8x1xf32>
    %cst_38 = arith.constant 3.125000e-02 : f32
    %66 = vector.broadcast %cst_38 : f32 to vector<8x1xf32>
    %67 = arith.mulf %65, %66 : vector<8x1xf32>
    %68 = arith.mulf %62, %62 : vector<8x1xf32>
    %69 = arith.subf %67, %68 : vector<8x1xf32>
    %70 = vector.broadcast %62 : vector<8x1xf32> to vector<8x128xf32>
    %71 = arith.subf %58, %70 : vector<8x128xf32>
    %cst_39 = arith.constant 9.99999974E-6 : f32
    %72 = vector.broadcast %cst_39 : f32 to vector<8x1xf32>
    %73 = arith.addf %69, %72 : vector<8x1xf32>
    %74 = math.rsqrt %73 : vector<8x1xf32>
    %75 = vector.broadcast %74 : vector<8x1xf32> to vector<8x128xf32>
    %76 = arith.mulf %71, %75 : vector<8x128xf32>
    %c6 = arith.constant 6 : index
    %c0_40 = arith.constant 0 : index
    %c0_41 = arith.constant 0 : index
    %77 = vector.load %arg2[%c6, %c0_40, %c0_41] : memref<16x1x128xf32, #tpu.memory_space<vmem>>, vector<1x1x128xf32>
    %78 = vector.shape_cast %77 : vector<1x1x128xf32> to vector<1x128xf32>
    %79 = vector.broadcast %78 : vector<1x128xf32> to vector<8x128xf32>
    %80 = arith.mulf %76, %79 : vector<8x128xf32>
    %c7 = arith.constant 7 : index
    %c0_42 = arith.constant 0 : index
    %c0_43 = arith.constant 0 : index
    %81 = vector.load %arg2[%c7, %c0_42, %c0_43] : memref<16x1x128xf32, #tpu.memory_space<vmem>>, vector<1x1x128xf32>
    %82 = vector.shape_cast %81 : vector<1x1x128xf32> to vector<1x128xf32>
    %83 = vector.broadcast %82 : vector<1x128xf32> to vector<8x128xf32>
    %84 = arith.addf %80, %83 : vector<8x128xf32>
    %c4_44 = arith.constant 4 : index
    %c0_45 = arith.constant 0 : index
    %c0_46 = arith.constant 0 : index
    %85 = vector.load %arg1[%c4_44, %c0_45, %c0_46] : memref<8x128x128xf32, #tpu.memory_space<vmem>>, vector<1x128x128xf32>
    %86 = vector.shape_cast %85 : vector<1x128x128xf32> to vector<128x128xf32>
    %cst_47 = arith.constant dense<0.000000e+00> : vector<8x128xf32>
    %87 = tpu.matmul %84, %86, %cst_47 {dimension_numbers = #tpu.dot_dimension_numbers<[1], [0], [0], [1], [0, 0, 1, 1], [], []>} : vector<8x128xf32>, vector<128x128xf32>, vector<8x128xf32> -> vector<8x128xf32>
    %c8 = arith.constant 8 : index
    %c0_48 = arith.constant 0 : index
    %c0_49 = arith.constant 0 : index
    %88 = vector.load %arg2[%c8, %c0_48, %c0_49] : memref<16x1x128xf32, #tpu.memory_space<vmem>>, vector<1x1x128xf32>
    %89 = vector.shape_cast %88 : vector<1x1x128xf32> to vector<1x128xf32>
    %90 = vector.broadcast %89 : vector<1x128xf32> to vector<8x128xf32>
    %91 = arith.addf %87, %90 : vector<8x128xf32>
    %92 = arith.addf %84, %91 : vector<8x128xf32>
    %cst_50 = arith.constant dense<0.000000e+00> : vector<8xf32>
    %93 = vector.multi_reduction <add>, %92, %cst_50 [1] : vector<8x128xf32> to vector<8xf32>
    %94 = vector.shape_cast %93 : vector<8xf32> to vector<8x1xf32>
    %cst_51 = arith.constant 3.125000e-02 : f32
    %95 = vector.broadcast %cst_51 : f32 to vector<8x1xf32>
    %96 = arith.mulf %94, %95 : vector<8x1xf32>
    %97 = arith.mulf %92, %92 : vector<8x128xf32>
    %cst_52 = arith.constant dense<0.000000e+00> : vector<8xf32>
    %98 = vector.multi_reduction <add>, %97, %cst_52 [1] : vector<8x128xf32> to vector<8xf32>
    %99 = vector.shape_cast %98 : vector<8xf32> to vector<8x1xf32>
    %cst_53 = arith.constant 3.125000e-02 : f32
    %100 = vector.broadcast %cst_53 : f32 to vector<8x1xf32>
    %101 = arith.mulf %99, %100 : vector<8x1xf32>
    %102 = arith.mulf %96, %96 : vector<8x1xf32>
    %103 = arith.subf %101, %102 : vector<8x1xf32>
    %104 = vector.broadcast %96 : vector<8x1xf32> to vector<8x128xf32>
    %105 = arith.subf %92, %104 : vector<8x128xf32>
    %cst_54 = arith.constant 9.99999974E-6 : f32
    %106 = vector.broadcast %cst_54 : f32 to vector<8x1xf32>
    %107 = arith.addf %103, %106 : vector<8x1xf32>
    %108 = math.rsqrt %107 : vector<8x1xf32>
    %109 = vector.broadcast %108 : vector<8x1xf32> to vector<8x128xf32>
    %110 = arith.mulf %105, %109 : vector<8x128xf32>
    %c11 = arith.constant 11 : index
    %c0_55 = arith.constant 0 : index
    %c0_56 = arith.constant 0 : index
    %111 = vector.load %arg2[%c11, %c0_55, %c0_56] : memref<16x1x128xf32, #tpu.memory_space<vmem>>, vector<1x1x128xf32>
    %112 = vector.shape_cast %111 : vector<1x1x128xf32> to vector<1x128xf32>
    %113 = vector.broadcast %112 : vector<1x128xf32> to vector<8x128xf32>
    %114 = arith.mulf %110, %113 : vector<8x128xf32>
    %c12 = arith.constant 12 : index
    %c0_57 = arith.constant 0 : index
    %c0_58 = arith.constant 0 : index
    %115 = vector.load %arg2[%c12, %c0_57, %c0_58] : memref<16x1x128xf32, #tpu.memory_space<vmem>>, vector<1x1x128xf32>
    %116 = vector.shape_cast %115 : vector<1x1x128xf32> to vector<1x128xf32>
    %117 = vector.broadcast %116 : vector<1x128xf32> to vector<8x128xf32>
    %118 = arith.addf %114, %117 : vector<8x128xf32>
    %c5_59 = arith.constant 5 : index
    %c0_60 = arith.constant 0 : index
    %c0_61 = arith.constant 0 : index
    %119 = vector.load %arg1[%c5_59, %c0_60, %c0_61] : memref<8x128x128xf32, #tpu.memory_space<vmem>>, vector<1x128x128xf32>
    %120 = vector.shape_cast %119 : vector<1x128x128xf32> to vector<128x128xf32>
    %cst_62 = arith.constant dense<0.000000e+00> : vector<8x128xf32>
    %121 = tpu.matmul %118, %120, %cst_62 {dimension_numbers = #tpu.dot_dimension_numbers<[1], [0], [0], [1], [0, 0, 1, 1], [], []>} : vector<8x128xf32>, vector<128x128xf32>, vector<8x128xf32> -> vector<8x128xf32>
    %c9 = arith.constant 9 : index
    %c0_63 = arith.constant 0 : index
    %c0_64 = arith.constant 0 : index
    %122 = vector.load %arg2[%c9, %c0_63, %c0_64] : memref<16x1x128xf32, #tpu.memory_space<vmem>>, vector<1x1x128xf32>
    %123 = vector.shape_cast %122 : vector<1x1x128xf32> to vector<1x128xf32>
    %124 = vector.broadcast %123 : vector<1x128xf32> to vector<8x128xf32>
    %125 = arith.addf %121, %124 : vector<8x128xf32>
    %cst_65 = arith.constant 0.000000e+00 : f32
    %126 = vector.broadcast %cst_65 : f32 to vector<8x128xf32>
    %127 = arith.maximumf %125, %126 : vector<8x128xf32>
    %c6_66 = arith.constant 6 : index
    %c0_67 = arith.constant 0 : index
    %c0_68 = arith.constant 0 : index
    %128 = vector.load %arg1[%c6_66, %c0_67, %c0_68] : memref<8x128x128xf32, #tpu.memory_space<vmem>>, vector<1x128x128xf32>
    %129 = vector.shape_cast %128 : vector<1x128x128xf32> to vector<128x128xf32>
    %cst_69 = arith.constant dense<0.000000e+00> : vector<8x128xf32>
    %130 = tpu.matmul %127, %129, %cst_69 {dimension_numbers = #tpu.dot_dimension_numbers<[1], [0], [0], [1], [0, 0, 1, 1], [], []>} : vector<8x128xf32>, vector<128x128xf32>, vector<8x128xf32> -> vector<8x128xf32>
    %c10 = arith.constant 10 : index
    %c0_70 = arith.constant 0 : index
    %c0_71 = arith.constant 0 : index
    %131 = vector.load %arg2[%c10, %c0_70, %c0_71] : memref<16x1x128xf32, #tpu.memory_space<vmem>>, vector<1x1x128xf32>
    %132 = vector.shape_cast %131 : vector<1x1x128xf32> to vector<1x128xf32>
    %133 = vector.broadcast %132 : vector<1x128xf32> to vector<8x128xf32>
    %134 = arith.addf %130, %133 : vector<8x128xf32>
    %135 = arith.addf %118, %134 : vector<8x128xf32>
    %cst_72 = arith.constant dense<0.000000e+00> : vector<8xf32>
    %136 = vector.multi_reduction <add>, %135, %cst_72 [1] : vector<8x128xf32> to vector<8xf32>
    %137 = vector.shape_cast %136 : vector<8xf32> to vector<8x1xf32>
    %cst_73 = arith.constant 3.125000e-02 : f32
    %138 = vector.broadcast %cst_73 : f32 to vector<8x1xf32>
    %139 = arith.mulf %137, %138 : vector<8x1xf32>
    %140 = arith.mulf %135, %135 : vector<8x128xf32>
    %cst_74 = arith.constant dense<0.000000e+00> : vector<8xf32>
    %141 = vector.multi_reduction <add>, %140, %cst_74 [1] : vector<8x128xf32> to vector<8xf32>
    %142 = vector.shape_cast %141 : vector<8xf32> to vector<8x1xf32>
    %cst_75 = arith.constant 3.125000e-02 : f32
    %143 = vector.broadcast %cst_75 : f32 to vector<8x1xf32>
    %144 = arith.mulf %142, %143 : vector<8x1xf32>
    %145 = arith.mulf %139, %139 : vector<8x1xf32>
    %146 = arith.subf %144, %145 : vector<8x1xf32>
    %147 = vector.broadcast %139 : vector<8x1xf32> to vector<8x128xf32>
    %148 = arith.subf %135, %147 : vector<8x128xf32>
    %cst_76 = arith.constant 9.99999974E-6 : f32
    %149 = vector.broadcast %cst_76 : f32 to vector<8x1xf32>
    %150 = arith.addf %146, %149 : vector<8x1xf32>
    %151 = math.rsqrt %150 : vector<8x1xf32>
    %152 = vector.broadcast %151 : vector<8x1xf32> to vector<8x128xf32>
    %153 = arith.mulf %148, %152 : vector<8x128xf32>
    %c7_77 = arith.constant 7 : index
    %c0_78 = arith.constant 0 : index
    %c0_79 = arith.constant 0 : index
    %154 = vector.load %arg1[%c7_77, %c0_78, %c0_79] : memref<8x128x128xf32, #tpu.memory_space<vmem>>, vector<1x128x128xf32>
    %155 = vector.shape_cast %154 : vector<1x128x128xf32> to vector<128x128xf32>
    %cst_80 = arith.constant dense<0.000000e+00> : vector<8x128xf32>
    %156 = tpu.matmul %153, %155, %cst_80 {dimension_numbers = #tpu.dot_dimension_numbers<[1], [0], [0], [1], [0, 0, 1, 1], [], []>} : vector<8x128xf32>, vector<128x128xf32>, vector<8x128xf32> -> vector<8x128xf32>
    %c15 = arith.constant 15 : index
    %c0_81 = arith.constant 0 : index
    %c0_82 = arith.constant 0 : index
    %157 = vector.load %arg2[%c15, %c0_81, %c0_82] : memref<16x1x128xf32, #tpu.memory_space<vmem>>, vector<1x1x128xf32>
    %158 = vector.shape_cast %157 : vector<1x1x128xf32> to vector<1x128xf32>
    %159 = vector.broadcast %158 : vector<1x128xf32> to vector<8x128xf32>
    %160 = arith.addf %156, %159 : vector<8x128xf32>
    %c0_83 = arith.constant 0 : index
    %c0_84 = arith.constant 0 : index
    %161 = vector.load %arg3[%c0_83, %c0_84] : memref<8x128xf32, #tpu.memory_space<vmem>>, vector<8x128xf32>
    tpu.vector_store %arg3[%c0_83, %c0_84], %160 {strides = array<i32>} : memref<8x128xf32, #tpu.memory_space<vmem>>, vector<8x128xf32>,
    return
  }
}

</mosaic_0001>

<bundles_post_ra>
// kernel: emotion_transformer.1
= control target key start
LH: loop header
LB: loop body
LE: loop exit
PB: predicated region body
PF: predicated region fallthrough
CT: control target
= control target key end

     0   :  { %8 = vsyncpa [#allocation3], 0  ;;  %s648_s0 = inlined_call_operand.vmem [shape: f32[8,128], index: 0, kind: input, shape index: {}]   ;;  %s649_s1 = inlined_call_operand.hbm [shape: f32[8,128,128], index: 1, kind: input, shape index: {}]   ;;  %s650_s2 = inlined_call_operand.hbm [shape: f32[16,1,128], index: 2, kind: input, shape index: {}]   ;;  %s651_s3 = inlined_call_operand.vmem [shape: f32[8,128], index: 3, kind: output, shape index: {}]  }
   0x1   :  { %s16_s14 = sshll.u32 %s649_s1, 4  ;;  %s17_s14 = int_to_ptr.hbm [resolvable:$true] %s16_s14 }
   0x2   :  { %9 = vsyncpa [#allocation5], 0  ;;  %s598_s15 = smov [#allocation2]   ;;  %s29_s19 = sshll.u32 %s650_s2, 4  ;;  %s30_s19 = int_to_ptr.hbm [resolvable:$true] %s29_s19 }
   0x3   :  { %s18_s16 = sshll.u32 %s598_s15, 4  ;;  %s599_s20 = smov 128   ;;  %s19_s16 = int_to_ptr.vmem [resolvable:$true] %s18_s16 }
   0x4   :  { %s600_s21 = smov 8   ;;  %s601_s22 = smov [#allocation4]  }
   0x5   :  { %24 = dma.hbm_to_vmem [thread:$0]  %s17_s14, 16384, %s19_s16, [#allocation3], %s599_s20, %s599_s20, %s600_s21  }
   0x6   :  { %s31_s23 = sshll.u32 %s601_s22, 4  ;;  %s602_s24 = smov 16   ;;  %s32_s23 = int_to_ptr.vmem [resolvable:$true] %s31_s23 }
   0x7   :  { %s603_s25 = smov 1  }
   0x8   :  { %37 = dma.hbm_to_vmem [thread:$0]  %s30_s19, 256, %s32_s23, [#allocation5], %s602_s24, %s602_s24, %s603_s25  }
   0x9   :  { %594 = dma.done.wait [#allocation3], 16384  }
   0xa   :  { %595 = vsyncadd [#allocation3], 4294950912 }
   0xb   :  { %596 = dma.done.wait [#allocation5], 256  }
   0xc   :  { %597 = vsyncadd [#allocation5], 4294967040  ;;  %v62_v0 = vld [vmem:[#allocation2 + $0x78] sm:$0xff]  ;;  %v61_v1 = vld [vmem:[#allocation2 + $0x70] sm:$0xff] }
   0xd   :  { %67 = vmatpush.msra.mxu0 %v62_v0  ;;  %v60_v2 = vld [vmem:[#allocation2 + $0x68] sm:$0xff]  ;;  %v59_v3 = vld [vmem:[#allocation2 + $0x60] sm:$0xff]  ;;  %v103_v4 = vld [vmem:[#allocation2 + $0xf8] sm:$0xff] }
   0xe   :  { %v58_v5 = vld [vmem:[#allocation2 + $0x58] sm:$0xff]  ;;  %109 = vmatpush.msra.mxu1 %v103_v4  ;;  %v102_v6 = vld [vmem:[#allocation2 + $0xf0] sm:$0xff]  ;;  %v101_v7 = vld [vmem:[#allocation2 + $0xe8] sm:$0xff] }
   0xf   :  { %68 = vmatpush.msra.mxu0 %v61_v1  ;;  %v57_v8 = vld [vmem:[#allocation2 + $0x50] sm:$0xff]  ;;  %v56_v9 = vld [vmem:[#allocation2 + $0x48] sm:$0xff]  ;;  %v100_v10 = vld [vmem:[#allocation2 + $0xe0] sm:$0xff] }
  0x10   :  { %110 = vmatpush.msra.mxu1 %v102_v6  ;;  %v55_v11 = vld [vmem:[#allocation2 + $0x40] sm:$0xff]  ;;  %v99_v12 = vld [vmem:[#allocation2 + $0xd8] sm:$0xff]  ;;  %v98_v13 = vld [vmem:[#allocation2 + $0xd0] sm:$0xff] }
  0x11   :  { %69 = vmatpush.msra.mxu0 %v60_v2  ;;  %v54_v14 = vld [vmem:[#allocation2 + $0x38] sm:$0xff]  ;;  %v97_v15 = vld [vmem:[#allocation2 + $0xc8] sm:$0xff]  ;;  %v53_v16 = vld [vmem:[#allocation2 + $0x30] sm:$0xff] }
  0x12   :  { %111 = vmatpush.msra.mxu1 %v101_v7  ;;  %v96_v17 = vld [vmem:[#allocation2 + $0xc0] sm:$0xff]  ;;  %v52_v18 = vld [vmem:[#allocation2 + $0x28] sm:$0xff]  ;;  %v95_v19 = vld [vmem:[#allocation2 + $0xb8] sm:$0xff] }
  0x13   :  { %70 = vmatpush.msra.mxu0 %v59_v3  ;;  %v51_v20 = vld [vmem:[#allocation2 + $0x20] sm:$0xff]  ;;  %v94_v21 = vld [vmem:[#allocation2 + $0xb0] sm:$0xff]  ;;  %v50_v22 = vld [vmem:[#allocation2 + $0x18] sm:$0xff] }
  0x14   :  { %112 = vmatpush.msra.mxu1 %v100_v10  ;;  %v93_v23 = vld [vmem:[#allocation2 + $0xa8] sm:$0xff]  ;;  %v49_v24 = vld [vmem:[#allocation2 + $0x10] sm:$0xff]  ;;  %v92_v25 = vld [vmem:[#allocation2 + $0xa0] sm:$0xff] }
  0x15   :  { %71 = vmatpush.msra.mxu0 %v58_v5  ;;  %v48_v26 = vld [vmem:[#allocation2 + $0x8] sm:$0xff]  ;;  %v91_v27 = vld [vmem:[#allocation2 + $0x98] sm:$0xff]  ;;  %v47_v28 = vld [vmem:[#allocation2] sm:$0xff] }
  0x16   :  { %113 = vmatpush.msra.mxu1 %v99_v12  ;;  %v46_v29 = vld [vmem:[%s648_s0] sm:$0xff]  ;;  %v90_v30 = vld [vmem:[#allocation2 + $0x90] sm:$0xff]  ;;  %v89_v31 = vld [vmem:[#allocation2 + $0x88] sm:$0xff] }
  0x17   :  { %72 = vmatpush.msra.mxu0 %v57_v8  ;;  %v88_v32 = vld [vmem:[#allocation2 + $0x80] sm:$0xff]  ;;  %v180_v41 = vld [vmem:[#allocation2 + $0x178] sm:$0xff]  ;;  %v179_v42 = vld [vmem:[#allocation2 + $0x170] sm:$0xff] }
  0x18   :  { %114 = vmatpush.msra.mxu1 %v98_v13  ;;  %v524_v33 = vld [vmem:[#allocation4] ss:$0 sm:$0xff]  ;;  %v525_v36 = vld [vmem:[#allocation4 + $0x1] ss:$0 sm:$0xff]  ;;  %186 = vmatpush.msra.mxu2 %v180_v41  ;;  %v178_v43 = vld [vmem:[#allocation2 + $0x168] sm:$0xff] }
  0x19   :  { %73 = vmatpush.msra.mxu0 %v56_v9  ;;  %v177_v44 = vld [vmem:[#allocation2 + $0x160] sm:$0xff]  ;;  %v176_v45 = vld [vmem:[#allocation2 + $0x158] sm:$0xff]  ;;  %v175_v46 = vld [vmem:[#allocation2 + $0x150] sm:$0xff] }
  0x1a   :  { %115 = vmatpush.msra.mxu1 %v97_v15  ;;  %187 = vmatpush.msra.mxu2 %v179_v42  ;;  %v174_v47 = vld [vmem:[#allocation2 + $0x148] sm:$0xff]  ;;  %v173_v48 = vld [vmem:[#allocation2 + $0x140] sm:$0xff]  ;;  %v172_v49 = vld [vmem:[#allocation2 + $0x138] sm:$0xff] }
  0x1b   :  { %74 = vmatpush.msra.mxu0 %v55_v11  ;;  %v171_v50 = vld [vmem:[#allocation2 + $0x130] sm:$0xff]  ;;  %v170_v51 = vld [vmem:[#allocation2 + $0x128] sm:$0xff]  ;;  %v169_v52 = vld [vmem:[#allocation2 + $0x120] sm:$0xff] }
  0x1c   :  { %116 = vmatpush.msra.mxu1 %v96_v17  ;;  %188 = vmatpush.msra.mxu2 %v178_v43  ;;  %v168_v53 = vld [vmem:[#allocation2 + $0x118] sm:$0xff]  ;;  %v167_v54 = vld [vmem:[#allocation2 + $0x110] sm:$0xff]  ;;  %v166_v56 = vld [vmem:[#allocation2 + $0x108] sm:$0xff] }
  0x1d   :  { %75 = vmatpush.msra.mxu0 %v54_v14  ;;  %v165_v57 = vld [vmem:[#allocation2 + $0x100] sm:$0xff]  ;;  %v223_v59 = vld [vmem:[#allocation2 + $0x1f8] sm:$0xff]  ;;  %v222_v60 = vld [vmem:[#allocation2 + $0x1f0] sm:$0xff] }
  0x1e   :  { %117 = vmatpush.msra.mxu1 %v95_v19  ;;  %189 = vmatpush.msra.mxu2 %v177_v44  ;;  %v221_v0 = vld [vmem:[#allocation2 + $0x1e8] sm:$0xff]  ;;  %v220_v2 = vld [vmem:[#allocation2 + $0x1e0] sm:$0xff]  ;;  %v219_v4 = vld [vmem:[#allocation2 + $0x1d8] sm:$0xff] }
  0x1f   :  { %76 = vmatpush.msra.mxu0 %v53_v16  ;;  %229 = vmatpush.msra.mxu3 %v223_v59  ;;  %v218_v5 = vld [vmem:[#allocation2 + $0x1d0] sm:$0xff]  ;;  %v217_v6 = vld [vmem:[#allocation2 + $0x1c8] sm:$0xff]  ;;  %v216_v7 = vld [vmem:[#allocation2 + $0x1c0] sm:$0xff] }
  0x20   :  { %118 = vmatpush.msra.mxu1 %v94_v21  ;;  %190 = vmatpush.msra.mxu2 %v176_v45  ;;  %v215_v9 = vld [vmem:[#allocation2 + $0x1b8] sm:$0xff]  ;;  %v214_v11 = vld [vmem:[#allocation2 + $0x1b0] sm:$0xff]  ;;  %v213_v13 = vld [vmem:[#allocation2 + $0x1a8] sm:$0xff] }
  0x21   :  { %77 = vmatpush.msra.mxu0 %v52_v18  ;;  %230 = vmatpush.msra.mxu3 %v222_v60  ;;  %v212_v15 = vld [vmem:[#allocation2 + $0x1a0] sm:$0xff]  ;;  %v211_v17 = vld [vmem:[#allocation2 + $0x198] sm:$0xff]  ;;  %v295_v43 = vld [vmem:[#allocation2 + $0x250] sm:$0xff] }
  0x22   :  { %119 = vmatpush.msra.mxu1 %v93_v23  ;;  %191 = vmatpush.msra.mxu2 %v175_v46  ;;  %v527_v23 = vld [vmem:[#allocation4 + $0x5] ss:$0 sm:$0xff]  ;;  %v296_v42 = vld [vmem:[#allocation2 + $0x258] sm:$0xff]  ;;  %v294_v44 = vld [vmem:[#allocation2 + $0x248] sm:$0xff] }
  0x23   :  { %78 = vmatpush.msra.mxu0 %v51_v20  ;;  %231 = vmatpush.msra.mxu3 %v221_v0  ;;  %v526_v20 = vld [vmem:[#allocation4 + $0x4] ss:$0 sm:$0xff]  ;;  %v292_v46 = vld [vmem:[#allocation2 + $0x238] sm:$0xff] }
  0x24   :  { %120 = vmatpush.msra.mxu1 %v92_v25  ;;  %192 = vmatpush.msra.mxu2 %v174_v47  ;;  %v297_v41 = vld [vmem:[#allocation2 + $0x260] sm:$0xff]  ;;  %v291_v47 = vld [vmem:[#allocation2 + $0x230] sm:$0xff] }
  0x25   :  { %79 = vmatpush.msra.mxu0 %v50_v22  ;;  %232 = vmatpush.msra.mxu3 %v220_v2  ;;  %v293_v45 = vld [vmem:[#allocation2 + $0x240] sm:$0xff] }
  0x26   :  { %121 = vmatpush.msra.mxu1 %v91_v27  ;;  %193 = vmatpush.msra.mxu2 %v173_v48  ;;  %v209_v27 = vld [vmem:[#allocation2 + $0x188] sm:$0xff] }
  0x27   :  { %80 = vmatpush.msra.mxu0 %v49_v24  ;;  %233 = vmatpush.msra.mxu3 %v219_v4  ;;  %v290_v48 = vld [vmem:[#allocation2 + $0x228] sm:$0xff]  ;;  %v530_v4 = vld [vmem:[#allocation4 + $0x6] ss:$0 sm:$0xff] }
  0x28   :  { %122 = vmatpush.msra.mxu1 %v90_v30  ;;  %194 = vmatpush.msra.mxu2 %v172_v49  ;;  %v289_v49 = vld [vmem:[#allocation2 + $0x220] sm:$0xff] }
  0x29   :  { %81 = vmatpush.msra.mxu0 %v48_v26  ;;  %234 = vmatpush.msra.mxu3 %v218_v5  ;;  %v210_v26 = vld [vmem:[#allocation2 + $0x190] sm:$0xff] }
  0x2a   :  { %123 = vmatpush.msra.mxu1 %v89_v31  ;;  %195 = vmatpush.msra.mxu2 %v171_v50  ;;  %v288_v50 = vld [vmem:[#allocation2 + $0x218] sm:$0xff] }
  0x2b   :  { %82 = vmatpush.msra.mxu0 %v47_v28  ;;  %235 = vmatpush.msra.mxu3 %v217_v6  ;;  %v208_v28 = vld [vmem:[#allocation2 + $0x180] sm:$0xff] }
  0x2c   :  { %83 = vmatmul.f32.vlgmr.msra.gmra.mxu0 %v46_v29  ;;  %124 = vmatpush.msra.mxu1 %v88_v32  ;;  %v528_v29 = vld [vmem:[#allocation4 + $0x2] ss:$0 sm:$0xff] }
  0x2d   :  { %196 = vmatpush.msra.mxu2 %v170_v51  ;;  %236 = vmatpush.msra.mxu3 %v216_v7  ;;  %v287_v51 = vld [vmem:[#allocation2 + $0x210] sm:$0xff]  ;;  %v531_v7 = vld [vmem:[#allocation4 + $0x7] ss:$0 sm:$0xff] }
  0x2f   :  { %197 = vmatpush.msra.mxu2 %v169_v52  ;;  %237 = vmatpush.msra.mxu3 %v215_v9 }
  0x31   :  { %198 = vmatpush.msra.mxu2 %v168_v53  ;;  %238 = vmatpush.msra.mxu3 %v214_v11  ;;  %v286_v53 = vld [vmem:[#allocation2 + $0x208] sm:$0xff] }
  0x33   :  { %199 = vmatpush.msra.mxu2 %v167_v54  ;;  %239 = vmatpush.msra.mxu3 %v213_v13  ;;  %v285_v54 = vld [vmem:[#allocation2 + $0x200] sm:$0xff] }
  0x35   :  { %200 = vmatpush.msra.mxu2 %v166_v56  ;;  %240 = vmatpush.msra.mxu3 %v212_v15  ;;  %v377_v15 = vld [vmem:[#allocation2 + $0x2f8] sm:$0xff] }
  0x36   :  { %383 = vmatpush.msrb.mxu1 %v377_v15  ;;  %v482_v15 = vld [vmem:[#allocation2 + $0x3e0] sm:$0xff] }
  0x37   :  { %201 = vmatpush.msra.mxu2 %v165_v57  ;;  %241 = vmatpush.msra.mxu3 %v211_v17  ;;  %v375_v17 = vld [vmem:[#allocation2 + $0x2e8] sm:$0xff] }
  0x39   :  { %242 = vmatpush.msra.mxu3 %v210_v26  ;;  %v366_v26 = vld [vmem:[#allocation2 + $0x2a0] sm:$0xff] }
  0x3b   :  { %243 = vmatpush.msra.mxu3 %v209_v27  ;;  %v365_v27 = vld [vmem:[#allocation2 + $0x298] sm:$0xff] }
  0x3d   :  { %244 = vmatpush.msra.mxu3 %v208_v28  ;;  %v364_v28 = vld [vmem:[#allocation2 + $0x290] sm:$0xff] }
  0xa9   :  { %v84_v34 = vpop.f32.mrf.mxu0 }
  0xaa   :  { %v85_v35 = vadd.f32 %v524_v33, %v84_v34  ;;  %v529_v33 = vld [vmem:[#allocation4 + $0x3] ss:$0 sm:$0xff] }
  0xac   :  { %125 = vmatmul.f32.vlgmr.msra.gmra.mxu1 %v85_v35 }
 0x129   :  { %v126_v37 = vpop.f32.mrf.mxu1 }
 0x12a   :  { %v127_v38 = vadd.f32 %v525_v36, %v126_v37 }
 0x12c   :  { %v633_v39 = vadd.f32 %v127_v38, %v85_v35  ;;  %v300_v38 = vld [vmem:[#allocation2 + $0x278] sm:$0xff] }
 0x12d   :  { %306 = vmatpush.msrb.mxu0 %v300_v38  ;;  %v418_v38 = vld [vmem:[#allocation2 + $0x368] sm:$0xff] }
 0x12e   :  { %130 = vadd.xlane.f32.xlu0 %v633_v39  ;;  %v133_v40 = vmul.f32 %v633_v39, %v633_v39 }
 0x136   :  { %134 = vadd.xlane.f32.xlu0 %v133_v40  ;;  %v298_v40 = vld [vmem:[#allocation2 + $0x268] sm:$0xff] }
 0x1a1   :  { %v131_v55 = vpop.xlane.xlu0 %130 }
 0x1a2   :  { %v132_v58 = vmul.f32 0.03125, %v131_v55 }
 0x1a4   :  { %v137_v62 = vmul.f32 %v132_v58, %v132_v58  ;;  %v139_v19 = vsub.f32 %v633_v39, %v132_v58  ;;  %v299_v39 = vld [vmem:[#allocation2 + $0x270] sm:$0xff] }
 0x1a5   :  { %307 = vmatpush.msrb.mxu0 %v299_v39 }
 0x1a7   :  { %308 = vmatpush.msrb.mxu0 %v298_v40  ;;  %v417_v40 = vld [vmem:[#allocation2 + $0x360] sm:$0xff] }
 0x1a9   :  { %v135_v61 = vpop.xlane.xlu0 %134  ;;  %309 = vmatpush.msrb.mxu0 %v297_v41 }
 0x1aa   :  { %v136_v63 = vmul.f32 0.03125, %v135_v61 }
 0x1ab   :  { %310 = vmatpush.msrb.mxu0 %v296_v42  ;;  %v416_v42 = vld [vmem:[#allocation2 + $0x358] sm:$0xff] }
 0x1ac   :  { %v138_v1 = vsub.f32 %v136_v63, %v137_v62 }
 0x1ad   :  { %311 = vmatpush.msrb.mxu0 %v295_v43  ;;  %v415_v43 = vld [vmem:[#allocation2 + $0x350] sm:$0xff] }
 0x1ae   :  { %v140_v3 = vadd.f32 1e-05, %v138_v1 }
 0x1af   :  { %312 = vmatpush.msrb.mxu0 %v294_v44  ;;  %v414_v44 = vld [vmem:[#allocation2 + $0x348] sm:$0xff] }
 0x1b0   :  { %538 = vrsqrt.f32 %v140_v3  ;;  %vm147_vm1 = vweird.f32 %v140_v3 }
 0x1b1   :  { %313 = vmatpush.msrb.mxu0 %v293_v45  ;;  %v413_v45 = vld [vmem:[#allocation2 + $0x340] sm:$0xff] }
 0x1b3   :  { %314 = vmatpush.msrb.mxu0 %v292_v46 }
 0x1b5   :  { %315 = vmatpush.msrb.mxu0 %v291_v47  ;;  %v412_v47 = vld [vmem:[#allocation2 + $0x338] sm:$0xff] }
 0x1b6   :  { %v539_v8 = vpop.eup %538 }
 0x1b7   :  { %v142_v10 = vmul.f32 %v539_v8, %v140_v3  ;;  %vm148_vm0 = vweird.f32 %v539_v8  ;;  %316 = vmatpush.msrb.mxu0 %v290_v48 }
 0x1b8   :  { %vm149_vm2 = vmor %vm147_vm1, %vm148_vm0 }
 0x1b9   :  { %v143_v12 = vmul.f32 %v539_v8, %v142_v10  ;;  %317 = vmatpush.msrb.mxu0 %v289_v49  ;;  %v532_v10 = vld [vmem:[#allocation4 + $0x8] ss:$0 sm:$0xff]  ;;  %v411_v49 = vld [vmem:[#allocation2 + $0x330] sm:$0xff] }
 0x1bb   :  { %v144_v14 = vmul.f32 0.5, %v143_v12  ;;  %318 = vmatpush.msrb.mxu0 %v288_v50 }
 0x1bd   :  { %v145_v16 = vsub.f32 1.5, %v144_v14  ;;  %319 = vmatpush.msrb.mxu0 %v287_v51  ;;  %v410_v51 = vld [vmem:[#allocation2 + $0x328] sm:$0xff] }
 0x1bf   :  { %v146_v18 = vmul.f32 %v539_v8, %v145_v16  ;;  %320 = vmatpush.msrb.mxu0 %v286_v53  ;;  %v376_v16 = vld [vmem:[#allocation2 + $0x2f0] sm:$0xff]  ;;  %v409_v53 = vld [vmem:[#allocation2 + $0x320] sm:$0xff] }
 0x1c0   :  { %384 = vmatpush.msrb.mxu1 %v376_v16  ;;  %v481_v16 = vld [vmem:[#allocation2 + $0x3d8] sm:$0xff] }
 0x1c1   :  { %v150_v21 = vsel %vm149_vm2, %v539_v8, %v146_v18  ;;  %321 = vmatpush.msrb.mxu0 %v285_v54  ;;  %v374_v18 = vld [vmem:[#allocation2 + $0x2e0] sm:$0xff] }
 0x1c2   :  { %v151_v22 = vmul.f32 %v150_v21, %v139_v19  ;;  %385 = vmatpush.msrb.mxu1 %v375_v17  ;;  %v373_v19 = vld [vmem:[#allocation2 + $0x2d8] sm:$0xff]  ;;  %v371_v21 = vld [vmem:[#allocation2 + $0x2c8] sm:$0xff]  ;;  %v480_v17 = vld [vmem:[#allocation2 + $0x3d0] sm:$0xff] }
 0x1c4   :  { %v157_v24 = vmul.f32 %v526_v20, %v151_v22  ;;  %386 = vmatpush.msrb.mxu1 %v374_v18  ;;  %v372_v20 = vld [vmem:[#allocation2 + $0x2d0] sm:$0xff]  ;;  %v370_v22 = vld [vmem:[#allocation2 + $0x2c0] sm:$0xff]  ;;  %v479_v18 = vld [vmem:[#allocation2 + $0x3c8] sm:$0xff] }
 0x1c6   :  { %v163_v25 = vadd.f32 %v527_v23, %v157_v24  ;;  %387 = vmatpush.msrb.mxu1 %v373_v19  ;;  %v369_v23 = vld [vmem:[#allocation2 + $0x2b8] sm:$0xff]  ;;  %v368_v24 = vld [vmem:[#allocation2 + $0x2b0] sm:$0xff]  ;;  %v478_v19 = vld [vmem:[#allocation2 + $0x3c0] sm:$0xff] }
 0x1c8   :  { %202 = vmatmul.f32.vlgmr.msra.gmra.mxu2 %v163_v25  ;;  %388 = vmatpush.msrb.mxu1 %v372_v20  ;;  %v477_v20 = vld [vmem:[#allocation2 + $0x3b8] sm:$0xff] }
 0x1ca   :  { %389 = vmatpush.msrb.mxu1 %v371_v21  ;;  %v476_v21 = vld [vmem:[#allocation2 + $0x3b0] sm:$0xff] }
 0x1cc   :  { %390 = vmatpush.msrb.mxu1 %v370_v22  ;;  %v475_v22 = vld [vmem:[#allocation2 + $0x3a8] sm:$0xff] }
 0x1ce   :  { %391 = vmatpush.msrb.mxu1 %v369_v23  ;;  %v474_v23 = vld [vmem:[#allocation2 + $0x3a0] sm:$0xff] }
 0x1d0   :  { %392 = vmatpush.msrb.mxu1 %v368_v24  ;;  %v473_v24 = vld [vmem:[#allocation2 + $0x398] sm:$0xff] }
 0x24b   :  { %v203_v30 = vpop.f32.mrf.mxu2 }
 0x24c   :  { %v204_v31 = vadd.f32 %v528_v29, %v203_v30  ;;  %v363_v30 = vld [vmem:[#allocation2 + $0x288] sm:$0xff] }
 0x24e   :  { %v206_v32 = vmax.f32 %v204_v31, 0.0  ;;  %v362_v31 = vld [vmem:[#allocation2 + $0x280] sm:$0xff] }
 0x250   :  { %245 = vmatmul.f32.vlgmr.msra.gmra.mxu3 %v206_v32 }
 0x2d3   :  { %v246_v34 = vpop.f32.mrf.mxu3 }
 0x2d4   :  { %v247_v35 = vadd.f32 %v529_v33, %v246_v34  ;;  %v420_v33 = vld [vmem:[#allocation2 + $0x378] sm:$0xff]  ;;  %v419_v34 = vld [vmem:[#allocation2 + $0x370] sm:$0xff] }
 0x2d5   :  { %426 = vmatpush.msrb.mxu2 %v420_v33 }
 0x2d6   :  { %v249_v36 = vadd.f32 %v247_v35, %v163_v25  ;;  %v367_v25 = vld [vmem:[#allocation2 + $0x2a8] sm:$0xff] }
 0x2d7   :  { %393 = vmatpush.msrb.mxu1 %v367_v25  ;;  %427 = vmatpush.msrb.mxu2 %v419_v34  ;;  %v472_v25 = vld [vmem:[#allocation2 + $0x390] sm:$0xff] }
 0x2d8   :  { %250 = vadd.xlane.f32.xlu1 %v249_v36  ;;  %v253_v37 = vmul.f32 %v249_v36, %v249_v36 }
 0x2d9   :  { %394 = vmatpush.msrb.mxu1 %v366_v26  ;;  %428 = vmatpush.msrb.mxu2 %v418_v38  ;;  %v471_v26 = vld [vmem:[#allocation2 + $0x388] sm:$0xff] }
 0x2db   :  { %395 = vmatpush.msrb.mxu1 %v365_v27  ;;  %429 = vmatpush.msrb.mxu2 %v417_v40  ;;  %v470_v27 = vld [vmem:[#allocation2 + $0x380] sm:$0xff] }
 0x2dd   :  { %396 = vmatpush.msrb.mxu1 %v364_v28  ;;  %430 = vmatpush.msrb.mxu2 %v416_v42 }
 0x2df   :  { %397 = vmatpush.msrb.mxu1 %v363_v30  ;;  %431 = vmatpush.msrb.mxu2 %v415_v43 }
 0x2e0   :  { %254 = vadd.xlane.f32.xlu1 %v253_v37 }
 0x2e1   :  { %398 = vmatpush.msrb.mxu1 %v362_v31  ;;  %432 = vmatpush.msrb.mxu2 %v414_v44  ;;  %v537_v44 = vld [vmem:[#allocation4 + $0xf] ss:$0 sm:$0xff] }
 0x2e3   :  { %433 = vmatpush.msrb.mxu2 %v413_v45 }
 0x2e5   :  { %434 = vmatpush.msrb.mxu2 %v412_v47 }
 0x2e7   :  { %435 = vmatpush.msrb.mxu2 %v411_v49 }
 0x2e9   :  { %436 = vmatpush.msrb.mxu2 %v410_v51 }
 0x2eb   :  { %437 = vmatpush.msrb.mxu2 %v409_v53 }
 0x34b   :  { %v251_v52 = vpop.xlane.xlu1 %250 }
 0x34c   :  { %v252_v55 = vmul.f32 0.03125, %v251_v52 }
 0x34e   :  { %v257_v57 = vmul.f32 %v252_v55, %v252_v55  ;;  %v259_v3 = vsub.f32 %v249_v36, %v252_v55  ;;  %v408_v55 = vld [vmem:[#allocation2 + $0x318] sm:$0xff] }
 0x34f   :  { %438 = vmatpush.msrb.mxu2 %v408_v55 }
 0x353   :  { %v255_v56 = vpop.xlane.xlu1 %254 }
 0x354   :  { %v256_v58 = vmul.f32 0.03125, %v255_v56 }
 0x356   :  { %v258_v59 = vsub.f32 %v256_v58, %v257_v57  ;;  %v533_v58 = vld [vmem:[#allocation4 + $0xb] ss:$0 sm:$0xff] }
 0x358   :  { %v260_v60 = vadd.f32 1e-05, %v258_v59 }
 0x35a   :  { %540 = vrsqrt.f32 %v260_v60  ;;  %vm267_vm4 = vweird.f32 %v260_v60 }
 0x360   :  { %v541_v61 = vpop.eup %540 }
 0x361   :  { %v262_v62 = vmul.f32 %v541_v61, %v260_v60  ;;  %vm268_vm3 = vweird.f32 %v541_v61 }
 0x362   :  { %vm269_vm5 = vmor %vm267_vm4, %vm268_vm3 }
 0x363   :  { %v263_v63 = vmul.f32 %v541_v61, %v262_v62 }
 0x365   :  { %v264_v0 = vmul.f32 0.5, %v263_v63 }
 0x367   :  { %v265_v1 = vsub.f32 1.5, %v264_v0  ;;  %v407_v0 = vld [vmem:[#allocation2 + $0x310] sm:$0xff] }
 0x368   :  { %439 = vmatpush.msrb.mxu2 %v407_v0 }
 0x369   :  { %v266_v2 = vmul.f32 %v541_v61, %v265_v1  ;;  %v406_v1 = vld [vmem:[#allocation2 + $0x308] sm:$0xff] }
 0x36a   :  { %440 = vmatpush.msrb.mxu2 %v406_v1 }
 0x36b   :  { %v270_v5 = vsel %vm269_vm5, %v541_v61, %v266_v2  ;;  %v534_v61 = vld [vmem:[#allocation4 + $0xc] ss:$0 sm:$0xff]  ;;  %v405_v2 = vld [vmem:[#allocation2 + $0x300] sm:$0xff] }
 0x36c   :  { %v271_v6 = vmul.f32 %v270_v5, %v259_v3  ;;  %441 = vmatpush.msrb.mxu2 %v405_v2  ;;  %v535_v3 = vld [vmem:[#allocation4 + $0x9] ss:$0 sm:$0xff] }
 0x36e   :  { %v277_v8 = vmul.f32 %v530_v4, %v271_v6 }
 0x370   :  { %v283_v9 = vadd.f32 %v531_v7, %v277_v8  ;;  %v485_v7 = vld [vmem:[#allocation2 + $0x3f8] sm:$0xff]  ;;  %v484_v8 = vld [vmem:[#allocation2 + $0x3f0] sm:$0xff] }
 0x371   :  { %491 = vmatpush.msrb.mxu3 %v485_v7 }
 0x372   :  { %322 = vmatmul.f32.vlgmr.msrb.gmra.mxu0 %v283_v9 }
 0x373   :  { %492 = vmatpush.msrb.mxu3 %v484_v8 }
 0x3ef   :  { %v323_v11 = vpop.f32.mrf.mxu0 }
 0x3f0   :  { %v324_v12 = vadd.f32 %v532_v10, %v323_v11 }
 0x3f2   :  { %v639_v13 = vadd.f32 %v324_v12, %v283_v9  ;;  %v536_v9 = vld [vmem:[#allocation4 + $0xa] ss:$0 sm:$0xff] }
 0x3f4   :  { %327 = vadd.xlane.f32.xlu2 %v639_v13  ;;  %v330_v14 = vmul.f32 %v639_v13, %v639_v13 }
 0x3fc   :  { %331 = vadd.xlane.f32.xlu2 %v330_v14  ;;  %v483_v14 = vld [vmem:[#allocation2 + $0x3e8] sm:$0xff] }
 0x3fd   :  { %493 = vmatpush.msrb.mxu3 %v483_v14 }
 0x3ff   :  { %494 = vmatpush.msrb.mxu3 %v482_v15 }
 0x401   :  { %495 = vmatpush.msrb.mxu3 %v481_v16 }
 0x403   :  { %496 = vmatpush.msrb.mxu3 %v480_v17 }
 0x405   :  { %497 = vmatpush.msrb.mxu3 %v479_v18 }
 0x407   :  { %498 = vmatpush.msrb.mxu3 %v478_v19 }
 0x409   :  { %499 = vmatpush.msrb.mxu3 %v477_v20 }
 0x40b   :  { %500 = vmatpush.msrb.mxu3 %v476_v21 }
 0x40d   :  { %501 = vmatpush.msrb.mxu3 %v475_v22 }
 0x40f   :  { %502 = vmatpush.msrb.mxu3 %v474_v23 }
 0x411   :  { %503 = vmatpush.msrb.mxu3 %v473_v24 }
 0x413   :  { %504 = vmatpush.msrb.mxu3 %v472_v25 }
 0x415   :  { %505 = vmatpush.msrb.mxu3 %v471_v26 }
 0x417   :  { %506 = vmatpush.msrb.mxu3 %v470_v27 }
 0x467   :  { %v328_v29 = vpop.xlane.xlu2 %327 }
 0x468   :  { %v329_v32 = vmul.f32 0.03125, %v328_v29 }
 0x46a   :  { %v334_v36 = vmul.f32 %v329_v32, %v329_v32  ;;  %v336_v57 = vsub.f32 %v639_v13, %v329_v32 }
 0x46f   :  { %v332_v35 = vpop.xlane.xlu2 %331 }
 0x470   :  { %v333_v37 = vmul.f32 0.03125, %v332_v35 }
 0x472   :  { %v335_v39 = vsub.f32 %v333_v37, %v334_v36 }
 0x474   :  { %v337_v41 = vadd.f32 1e-05, %v335_v39 }
 0x476   :  { %542 = vrsqrt.f32 %v337_v41  ;;  %vm344_vm7 = vweird.f32 %v337_v41 }
 0x47c   :  { %v543_v46 = vpop.eup %542 }
 0x47d   :  { %v339_v48 = vmul.f32 %v543_v46, %v337_v41  ;;  %vm345_vm6 = vweird.f32 %v543_v46 }
 0x47e   :  { %vm346_vm8 = vmor %vm344_vm7, %vm345_vm6 }
 0x47f   :  { %v340_v50 = vmul.f32 %v543_v46, %v339_v48 }
 0x481   :  { %v341_v52 = vmul.f32 0.5, %v340_v50 }
 0x483   :  { %v342_v54 = vsub.f32 1.5, %v341_v52 }
 0x485   :  { %v343_v56 = vmul.f32 %v543_v46, %v342_v54 }
 0x487   :  { %v347_v59 = vsel %vm346_vm8, %v543_v46, %v343_v56 }
 0x488   :  { %v348_v60 = vmul.f32 %v347_v59, %v336_v57 }
 0x48a   :  { %v354_v62 = vmul.f32 %v533_v58, %v348_v60 }
 0x48c   :  { %v360_v63 = vadd.f32 %v534_v61, %v354_v62 }
 0x48e   :  { %399 = vmatmul.f32.vlgmr.msrb.gmra.mxu1 %v360_v63 }
 0x50b   :  { %v400_v4 = vpop.f32.mrf.mxu1 }
 0x50c   :  { %v401_v5 = vadd.f32 %v535_v3, %v400_v4 }
 0x50e   :  { %v403_v6 = vmax.f32 %v401_v5, 0.0 }
 0x510   :  { %442 = vmatmul.f32.vlgmr.msrb.gmra.mxu2 %v403_v6 }
 0x593   :  { %v443_v10 = vpop.f32.mrf.mxu2 }
 0x594   :  { %v444_v11 = vadd.f32 %v536_v9, %v443_v10 }
 0x596   :  { %v446_v12 = vadd.f32 %v444_v11, %v360_v63 }
 0x598   :  { %447 = vadd.xlane.f32.xlu0 %v446_v12  ;;  %v450_v13 = vmul.f32 %v446_v12, %v446_v12 }
 0x59a   :  { %451 = vadd.xlane.f32.xlu1 %v450_v13 }
 0x60b   :  { %v448_v28 = vpop.xlane.xlu0 %447 }
 0x60c   :  { %v449_v29 = vmul.f32 0.03125, %v448_v28 }
 0x60d   :  { %v452_v30 = vpop.xlane.xlu1 %451 }
 0x60e   :  { %v454_v31 = vmul.f32 %v449_v29, %v449_v29  ;;  %v453_v32 = vmul.f32 0.03125, %v452_v30  ;;  %v456_v41 = vsub.f32 %v446_v12, %v449_v29 }
 0x610   :  { %v455_v33 = vsub.f32 %v453_v32, %v454_v31 }
 0x612   :  { %v457_v34 = vadd.f32 1e-05, %v455_v33 }
 0x614   :  { %544 = vrsqrt.f32 %v457_v34  ;;  %vm464_vm10 = vweird.f32 %v457_v34 }
 0x61a   :  { %v545_v35 = vpop.eup %544 }
 0x61b   :  { %v459_v36 = vmul.f32 %v545_v35, %v457_v34  ;;  %vm465_vm9 = vweird.f32 %v545_v35 }
 0x61c   :  { %vm466_vm11 = vmor %vm464_vm10, %vm465_vm9 }
 0x61d   :  { %v460_v37 = vmul.f32 %v545_v35, %v459_v36 }
 0x61f   :  { %v461_v38 = vmul.f32 0.5, %v460_v37 }
 0x621   :  { %v462_v39 = vsub.f32 1.5, %v461_v38 }
 0x623   :  { %v463_v40 = vmul.f32 %v545_v35, %v462_v39 }
 0x625   :  { %v467_v42 = vsel %vm466_vm11, %v545_v35, %v463_v40 }
 0x626   :  { %v468_v43 = vmul.f32 %v467_v42, %v456_v41 }
 0x628   :  { %507 = vmatmul.f32.vlgmr.msrb.gmra.mxu3 %v468_v43 }
 0x6ab   :  { %v508_v45 = vpop.f32.mrf.mxu3 }
 0x6ac   :  { %v509_v46 = vadd.f32 %v537_v44, %v508_v45 }
 0x6ae   :  { %511 = vst [vmem:[%s651_s3] sm:$0xff] %v509_v46 }
 0x6af   :  { %516 = vsyncpa [#allocation3], 1 }
 0x6b0   :  { %517 = vsyncpa [#allocation5], 1 }

</bundles_post_ra>
